<compile_context>
chip_gen: v5e
topology: v5e:2x2
jax: 0.10.0
libtpu: 0.0.40
codegen_flags: <defaults>
</compile_context>

<pallas_src>
import jax
import jax.numpy as jnp
from jax.experimental import pallas as pl
from jax.experimental.pallas import tpu as pltpu


def tea_kernel(xt_ref, wk_ref, wv_ref, ot_ref):
    # xt_ref: (L, TM)  queries^T tile, lane-dense in M = BN*F
    # wk_ref: (S, L)   mk.weight   (no transpose needed in this layout)
    # wv_ref: (L, S)   mv.weight
    # ot_ref: (L, TM)  out^T tile, lane-dense store
    xt = xt_ref[...]

    # attn^T = Wk @ X^T  -> (S, TM), f32 accumulation on the MXU
    at = jnp.dot(wk_ref[...], xt, preferred_element_type=jnp.float32)

    # Numerically-stable softmax over S (axis 0 in the transposed layout).
    at = at - jnp.max(at, axis=0, keepdims=True)
    p = jnp.exp(at)
    denom = jnp.sum(p, axis=0, keepdims=True)            # (1, TM)

    # out^T = Wv @ p_unnormalized^T -> (L, TM); fold 1/denom into a post-scale.
    ot = jnp.dot(wv_ref[...], p, preferred_element_type=jnp.float32)
    ot_ref[...] = (ot * pl.reciprocal(denom)).astype(ot_ref.dtype)


def temporal_external_attn(queries, mk_weight, mv_weight, *, max_tile_m=512):
    """queries: [BN, F, L]; mk_weight: [S, L]; mv_weight: [L, S] -> [BN, F, L]."""
    BN, F, L = queries.shape
    S, Lw = mk_weight.shape
    assert Lw == L and mv_weight.shape == (L, S)
    M = BN * F

    # Transposed layout: M becomes the lane (last) dim -> lane-dense input + output.
    xt = queries.reshape(M, L).T                          # (L, M)

    # Largest lane-aligned tile over M (multiple of 128) that divides M; otherwise a
    # single whole-array block (block == full array dims is always legal).
    tm = M
    for cand in (max_tile_m, 256, 128):
        if cand <= M and M % cand == 0:
            tm = cand
            break

    out_t = pl.pallas_call(
        tea_kernel,
        out_shape=jax.ShapeDtypeStruct((L, M), queries.dtype),
        grid_spec=pltpu.PrefetchScalarGridSpec(
            num_scalar_prefetch=0,
            grid=(M // tm,),
            in_specs=[
                pl.BlockSpec((L, tm), lambda i: (0, i)),   # X^T tile
                pl.BlockSpec((S, L), lambda i: (0, 0)),    # Wk, constant -> DMA'd once
                pl.BlockSpec((L, S), lambda i: (0, 0)),    # Wv, constant -> DMA'd once
            ],
            out_specs=pl.BlockSpec((L, tm), lambda i: (0, i)),
        ),
        compiler_params=pltpu.CompilerParams(
            dimension_semantics=("parallel",),             # megacore-shardable on v7x
        ),
    )(xt, mk_weight, mv_weight)

    # Layout plumbing back to the module's [BN, F, L] output.
    return out_t.T.reshape(BN, F, L)


if __name__ == "__main__":
    # BN = Batch*Nodes = 8, F = FeatureDim = 16, L = SeqLen (d_model) = 12, S = s_dim = 64
    BN, F, L, S = 8, 16, 12, 64

    key = jax.random.PRNGKey(0)
    kx, kk, kv = jax.random.split(key, 3)

    queries = jax.random.normal(kx, (BN, F, L), dtype=jnp.float32)

    # nn.Linear-style init: mk.weight [S, L], mv.weight [L, S] (passed as-is).
    bound_k = 1.0 / jnp.sqrt(jnp.float32(L))
    bound_v = 1.0 / jnp.sqrt(jnp.float32(S))
    mk_weight = jax.random.uniform(kk, (S, L), jnp.float32, -bound_k, bound_k)
    mv_weight = jax.random.uniform(kv, (L, S), jnp.float32, -bound_v, bound_v)

    out = temporal_external_attn(queries, mk_weight, mv_weight)
    out = jax.block_until_ready(out)

    # Pure-JAX reference (same math as the PyTorch forward).
    attn_ref = jax.nn.softmax(jnp.einsum("bfl,sl->bfs", queries, mk_weight), axis=-1)
    ref = jnp.einsum("bfs,ls->bfl", attn_ref, mv_weight)

    assert out.shape == (BN, F, L)
    assert jnp.allclose(out, ref, atol=1e-5, rtol=1e-5), float(jnp.max(jnp.abs(out - ref)))

    print("KERNEL_OK")
</pallas_src>

<mosaic_0001>
module attributes {stable_mosaic.version = 11 : i64} {
  func.func @tea_kernel(%arg0: i32, %arg1: memref<12x128xf32, #tpu.memory_space<vmem>>, %arg2: memref<64x12xf32, #tpu.memory_space<vmem>>, %arg3: memref<12x64xf32, #tpu.memory_space<vmem>>, %arg4: memref<12x128xf32, #tpu.memory_space<vmem>>) attributes {dimension_semantics = [#tpu.dimension_semantics<parallel>], iteration_bounds = array<i64: 1>, scalar_prefetch = 0 : i64, scratch_operands = 0 : i64, tpu.core_type = #tpu.core_type<tc>, window_params = [{transform_indices = @transform_0, window_bounds = array<i64: 12, 128>}, {pipeline_mode = #tpu.pipeline_mode<synchronous>, transform_indices = @transform_1, window_bounds = array<i64: 64, 12>}, {pipeline_mode = #tpu.pipeline_mode<synchronous>, transform_indices = @transform_2, window_bounds = array<i64: 12, 64>}, {transform_indices = @transform_3, window_bounds = array<i64: 12, 128>}]} {
    %c0 = arith.constant 0 : index
    %c0_0 = arith.constant 0 : index
    %0 = vector.load %arg1[%c0, %c0_0] : memref<12x128xf32, #tpu.memory_space<vmem>>, vector<12x128xf32>
    %c0_1 = arith.constant 0 : index
    %c0_2 = arith.constant 0 : index
    %1 = vector.load %arg2[%c0_1, %c0_2] : memref<64x12xf32, #tpu.memory_space<vmem>>, vector<64x12xf32>
    %cst = arith.constant dense<0.000000e+00> : vector<64x128xf32>
    %2 = tpu.matmul %1, %0, %cst {dimension_numbers = #tpu.dot_dimension_numbers<[1], [0], [0], [1], [0, 0, 1, 1], [], []>} : vector<64x12xf32>, vector<12x128xf32>, vector<64x128xf32> -> vector<64x128xf32>
    %cst_3 = arith.constant dense<0xFF800000> : vector<128xf32>
    %3 = vector.multi_reduction <maximumf>, %2, %cst_3 [0] : vector<64x128xf32> to vector<128xf32>
    %4 = vector.shape_cast %3 : vector<128xf32> to vector<1x128xf32>
    %5 = vector.broadcast %4 : vector<1x128xf32> to vector<64x128xf32>
    %6 = arith.subf %2, %5 : vector<64x128xf32>
    %7 = math.exp %6 : vector<64x128xf32>
    %cst_4 = arith.constant dense<0.000000e+00> : vector<128xf32>
    %8 = vector.multi_reduction <add>, %7, %cst_4 [0] : vector<64x128xf32> to vector<128xf32>
    %9 = vector.shape_cast %8 : vector<128xf32> to vector<1x128xf32>
    %c0_5 = arith.constant 0 : index
    %c0_6 = arith.constant 0 : index
    %10 = vector.load %arg3[%c0_5, %c0_6] : memref<12x64xf32, #tpu.memory_space<vmem>>, vector<12x64xf32>
    %cst_7 = arith.constant dense<0.000000e+00> : vector<12x128xf32>
    %11 = tpu.matmul %10, %7, %cst_7 {dimension_numbers = #tpu.dot_dimension_numbers<[1], [0], [0], [1], [0, 0, 1, 1], [], []>} : vector<12x64xf32>, vector<64x128xf32>, vector<12x128xf32> -> vector<12x128xf32>
    %12 = tpu.reciprocal %9 : vector<1x128xf32> -> vector<1x128xf32>
    %13 = vector.broadcast %12 : vector<1x128xf32> to vector<12x128xf32>
    %14 = arith.mulf %11, %13 : vector<12x128xf32>
    %c0_8 = arith.constant 0 : index
    %c0_9 = arith.constant 0 : index
    %15 = vector.load %arg4[%c0_8, %c0_9] : memref<12x128xf32, #tpu.memory_space<vmem>>, vector<12x128xf32>
    tpu.vector_store %arg4[%c0_8, %c0_9], %14 {strides = array<i32>} : memref<12x128xf32, #tpu.memory_space<vmem>>, vector<12x128xf32>,
    return
  }
  func.func @transform_0(%arg0: i32) -> (i32, i32) {
    %c0_i32 = arith.constant 0 : i32
    %c0_i32_0 = arith.constant 0 : i32
    return %c0_i32, %arg0 : i32, i32
  }
  func.func @transform_1(%arg0: i32) -> (i32, i32) {
    %c0_i32 = arith.constant 0 : i32
    %c0_i32_0 = arith.constant 0 : i32
    %c0_i32_1 = arith.constant 0 : i32
    return %c0_i32, %c0_i32_0 : i32, i32
  }
  func.func @transform_2(%arg0: i32) -> (i32, i32) {
    %c0_i32 = arith.constant 0 : i32
    %c0_i32_0 = arith.constant 0 : i32
    %c0_i32_1 = arith.constant 0 : i32
    return %c0_i32, %c0_i32_0 : i32, i32
  }
  func.func @transform_3(%arg0: i32) -> (i32, i32) {
    %c0_i32 = arith.constant 0 : i32
    %c0_i32_0 = arith.constant 0 : i32
    return %c0_i32, %arg0 : i32, i32
  }
}

</mosaic_0001>

<bundles_post_ra>
// kernel: tpu_custom_call.1
= control target key start
LH: loop header
LB: loop body
LE: loop exit
PB: predicated region body
PF: predicated region fallthrough
CT: control target
= control target key end

     0   :  { %vm50_vm0 = vcmask 1043456   ;;  %vm25_vm1 = vcmask 97280   ;;  %s353_s0 = inlined_call_operand.vmem [shape: f32[12,128], index: 0, kind: input, shape index: {}]   ;;  %s354_s1 = inlined_call_operand.vmem [shape: f32[64,12], index: 1, kind: input, shape index: {}]   ;;  %s355_s2 = inlined_call_operand.vmem [shape: f32[12,64], index: 2, kind: input, shape index: {}]   ;;  %s356_s3 = inlined_call_operand.hbm [shape: f32[12,128], index: 3, kind: output, shape index: {}]  }
   0x1   :  { %v16_v0 = vld [vmem:[%s353_s0 + $0x8] sm:$0xf]  ;;  %v15_v1 = vld [vmem:[%s353_s0] sm:$0xff]  ;;  %v20_v3 = vld [vmem:[%s354_s1 + $0x18] sm:$0xff] }
   0x2   :  { %213 = vmatpush.msk.msra.mxu0 %vm50_vm0, %v16_v0  ;;  %224 = vmatpush.msk.msra.mxu2 %vm50_vm0, %v16_v0  ;;  %v17_v2 = vld [vmem:[%s354_s1] sm:$0xff]  ;;  %v23_v4 = vld [vmem:[%s354_s1 + $0x30] sm:$0xff] }
   0x3   :  { %225 = vmatpush.msk.msra.mxu3 %vm50_vm0, %v16_v0 }
   0x4   :  { %69 = vmatpush.msra.mxu0 %v15_v1  ;;  %226 = vmatpush.msra.mxu2 %v15_v1 }
   0x5   :  { %8 = vsyncpa [#allocation3], 0  ;;  %227 = vmatpush.msra.mxu3 %v15_v1  ;;  %214 = vmatmul.msk.f32.vlgmr.msra.gmra.mxu0 %vm25_vm1, %v17_v2  ;;  %v18_v5 = vld [vmem:[%s354_s1 + $0x8] sm:$0xff]  ;;  %v21_v6 = vld [vmem:[%s354_s1 + $0x20] sm:$0xff]  ;;  %vm147_vm2 = vcmask 523264   ;;  %s201_s10 = sshll.u32 %s356_s3, 4  ;;  %s202_s10 = int_to_ptr.hbm [resolvable:$true] %s201_s10 }
   0x6   :  { %217 = vmatmul.msk.f32.vlgmr.msra.gmra.mxu2 %vm25_vm1, %v20_v3  ;;  %220 = vmatmul.msk.f32.vlgmr.msra.gmra.mxu3 %vm25_vm1, %v23_v4  ;;  %v24_v7 = vld [vmem:[%s354_s1 + $0x38] sm:$0xff]  ;;  %v19_v8 = vld [vmem:[%s354_s1 + $0x10] sm:$0xff]  ;;  %v22_v9 = vld [vmem:[%s354_s1 + $0x28] sm:$0xff]  ;;  %s284_s11 = smov 128   ;;  %s285_s12 = smov 8  }
   0x7   :  { %v145_v58 = vld [vmem:[%s355_s2] sm:$0xff]  ;;  %v146_v59 = vld [vmem:[%s355_s2 + $0x8] sm:$0xf]  ;;  %s283_s2 = smov [#allocation2]  }
   0x8   :  { %s199_s7 = sshll.u32 %s283_s2, 4  ;;  %s200_s7 = int_to_ptr.vmem [resolvable:$true] %s199_s7 }
   0xd   :  { %215 = vmatmul.msk.f32.gmra.mxu0 %vm25_vm1, %v18_v5 }
   0xe   :  { %218 = vmatmul.msk.f32.gmra.mxu2 %vm25_vm1, %v21_v6  ;;  %221 = vmatmul.msk.f32.gmra.mxu3 %vm25_vm1, %v24_v7 }
  0x15   :  { %216 = vmatmul.msk.f32.gmra.mxu0 %vm25_vm1, %v19_v8 }
  0x16   :  { %219 = vmatmul.msk.f32.gmra.mxu2 %vm25_vm1, %v22_v9 }
  0x82   :  { %v71_v10 = vpop.f32.mrf.mxu0 }
  0x89   :  { %v80_v11 = vpop.f32.mrf.mxu2  ;;  %v89_v13 = vpop.f32.mrf.mxu3 }
  0x8a   :  { %v74_v12 = vpop.f32.mrf.mxu0 }
  0x91   :  { %v83_v14 = vpop.f32.mrf.mxu2  ;;  %v92_v16 = vpop.f32.mrf.mxu3 }
  0x92   :  { %v77_v15 = vpop.f32.mrf.mxu0  ;;  %v95_v19 = vmax.f32 %v71_v10, %v83_v14  ;;  %v98_v20 = vmax.f32 %v80_v11, %v92_v16 }
  0x93   :  { %v97_v17 = vmax.f32 %v77_v15, %v89_v13 }
  0x95   :  { %v100_v22 = vmax.f32 %v97_v17, %v98_v20 }
  0x99   :  { %v86_v18 = vpop.f32.mrf.mxu2 }
  0x9a   :  { %v96_v21 = vmax.f32 %v74_v12, %v86_v18 }
  0x9c   :  { %v99_v23 = vmax.f32 %v95_v19, %v96_v21 }
  0x9e   :  { %v101_v24 = vmax.f32 %v99_v23, %v100_v22 }
  0xa0   :  { %v102_v25 = vrot.slane %v101_v24, 4 }
  0xa2   :  { %v103_v26 = vmax.f32 %v101_v24, %v102_v25 }
  0xa4   :  { %v104_v27 = vrot.slane %v103_v26, 2 }
  0xa6   :  { %v105_v28 = vmax.f32 %v103_v26, %v104_v27 }
  0xa8   :  { %v106_v29 = vrot.slane %v105_v28, 1 }
  0xaa   :  { %v107_v30 = vmax.f32 %v105_v28, %v106_v29 }
  0xac   :  { %v113_v31 = vsub.f32 %v86_v18, %v107_v30  ;;  %v115_v32 = vsub.f32 %v92_v16, %v107_v30  ;;  %v114_v33 = vsub.f32 %v89_v13, %v107_v30  ;;  %v112_v34 = vsub.f32 %v83_v14, %v107_v30 }
  0xad   :  { %v109_v36 = vsub.f32 %v74_v12, %v107_v30  ;;  %v108_v38 = vsub.f32 %v71_v10, %v107_v30  ;;  %v111_v40 = vsub.f32 %v80_v11, %v107_v30  ;;  %v110_v42 = vsub.f32 %v77_v15, %v107_v30 }
  0xae   :  { %v130_v35 = vmul.f32 1.442695, %v115_v32  ;;  %v128_v37 = vmul.f32 1.442695, %v114_v33  ;;  %v126_v39 = vmul.f32 1.442695, %v113_v31 }
  0xaf   :  { %v124_v41 = vmul.f32 1.442695, %v112_v34  ;;  %v118_v43 = vmul.f32 1.442695, %v109_v36  ;;  %v116_v44 = vmul.f32 1.442695, %v108_v38 }
  0xb0   :  { %239 = vpow2.f32 %v130_v35  ;;  %v122_v45 = vmul.f32 1.442695, %v111_v40  ;;  %v120_v46 = vmul.f32 1.442695, %v110_v42 }
  0xb1   :  { %241 = vpow2.f32 %v128_v37 }
  0xb2   :  { %243 = vpow2.f32 %v126_v39 }
  0xb3   :  { %245 = vpow2.f32 %v124_v41 }
  0xb4   :  { %247 = vpow2.f32 %v118_v43 }
  0xb5   :  { %249 = vpow2.f32 %v116_v44 }
  0xb6   :  { %v240_v47 = vpop.eup %239  ;;  %251 = vpow2.f32 %v122_v45 }
  0xb7   :  { %162 = vmatpush.msra.mxu1 %v240_v47  ;;  %228 = vmatpush.msrb.mxu3 %v240_v47  ;;  %v242_v48 = vpop.eup %241  ;;  %253 = vpow2.f32 %v120_v46 }
  0xb8   :  { %v244_v49 = vpop.eup %243 }
  0xb9   :  { %163 = vmatpush.msra.mxu1 %v242_v48  ;;  %229 = vmatpush.msrb.mxu3 %v242_v48  ;;  %v246_v50 = vpop.eup %245 }
  0xba   :  { %v248_v51 = vpop.eup %247 }
  0xbb   :  { %164 = vmatpush.msra.mxu1 %v244_v49  ;;  %230 = vmatpush.msrb.mxu3 %v244_v49  ;;  %v250_v52 = vpop.eup %249 }
  0xbc   :  { %v252_v53 = vpop.eup %251  ;;  %v132_v54 = vadd.f32 %v250_v52, %v248_v51 }
  0xbd   :  { %165 = vmatpush.msra.mxu1 %v246_v50  ;;  %231 = vmatpush.msrb.mxu3 %v246_v50  ;;  %v254_v55 = vpop.eup %253 }
  0xbe   :  { %v133_v56 = vadd.f32 %v254_v55, %v132_v54 }
  0xbf   :  { %166 = vmatpush.msra.mxu1 %v252_v53  ;;  %232 = vmatpush.msrb.mxu3 %v252_v53 }
  0xc0   :  { %v134_v57 = vadd.f32 %v252_v53, %v133_v56 }
  0xc1   :  { %167 = vmatpush.msra.mxu1 %v254_v55  ;;  %233 = vmatpush.msrb.mxu3 %v254_v55 }
  0xc2   :  { %v135_v60 = vadd.f32 %v246_v50, %v134_v57 }
  0xc3   :  { %168 = vmatpush.msra.mxu1 %v248_v51  ;;  %234 = vmatpush.msrb.mxu3 %v248_v51 }
  0xc4   :  { %v136_v61 = vadd.f32 %v244_v49, %v135_v60 }
  0xc5   :  { %169 = vmatpush.msra.mxu1 %v250_v52  ;;  %235 = vmatpush.msrb.mxu3 %v250_v52 }
  0xc6   :  { %222 = vmatmul.msk.f32.vlgmr.msra.gmra.mxu1 %vm147_vm2, %v145_v58  ;;  %223 = vmatmul.msk.f32.vlgmr.msrb.gmra.mxu3 %vm147_vm2, %v146_v59  ;;  %v137_v62 = vadd.f32 %v242_v48, %v136_v61 }
  0xc8   :  { %v138_v63 = vadd.f32 %v240_v47, %v137_v62 }
  0xca   :  { %v139_v0 = vrot.slane %v138_v63, 4 }
  0xcc   :  { %v140_v1 = vadd.f32 %v139_v0, %v138_v63 }
  0xce   :  { %v141_v2 = vrot.slane %v140_v1, 2 }
  0xd0   :  { %v142_v3 = vadd.f32 %v141_v2, %v140_v1 }
  0xd2   :  { %v143_v4 = vrot.slane %v142_v3, 1 }
  0xd4   :  { %v144_v5 = vadd.f32 %v143_v4, %v142_v3 }
  0xd6   :  { %255 = vrcp.f32 %v144_v5  ;;  %v188_v11 = vand.u32 2147483648, %v144_v5  ;;  %vm182_vm4 = vweird.f32 %v144_v5  ;;  %v186_v12 = vand.u32 2147483647, %v144_v5 }
  0xd8   :  { %v189_v14 = vor.u32 1.1754944e-38, %v188_v11  ;;  %vm187_vm6 = vcmp.eq.f32.partialorder %v186_v12, 8.507059e+37 }
  0xdc   :  { %v256_v6 = vpop.eup %255 }
  0xdd   :  { %v178_v7 = vmul.f32 %v256_v6, %v144_v5  ;;  %vm183_vm3 = vweird.f32 %v256_v6 }
  0xde   :  { %vm184_vm5 = vmor %vm182_vm4, %vm183_vm3 }
  0xdf   :  { %v179_v8 = vsub.f32 1.0, %v178_v7 }
  0xe1   :  { %v180_v9 = vmul.f32 %v256_v6, %v179_v8 }
  0xe3   :  { %v181_v10 = vadd.f32 %v256_v6, %v180_v9 }
  0xe5   :  { %v185_v13 = vsel %vm184_vm5, %v256_v6, %v181_v10 }
  0xe6   :  { %v190_v16 = vsel %vm187_vm6, %v189_v14, %v185_v13 }
 0x143   :  { %v171_v15 = vpop.f32.mrf.mxu1 }
 0x144   :  { %v191_v17 = vmul.f32 %v190_v16, %v171_v15 }
 0x146   :  { %193 = vst [vmem:[#allocation2] sm:$0xff] %v191_v17 }
 0x149   :  { %v174_v18 = vpop.f32.mrf.mxu3 }
 0x14a   :  { %v192_v19 = vmul.f32 %v190_v16, %v174_v18 }
 0x14c   :  { %194 = vst [vmem:[#allocation2 + $0x8] sm:$0xf] %v192_v19 }
 0x14d   :  { %207 = dma.vmem_to_hbm [thread:$0]  %s200_s7, 256, %s202_s10, [#allocation3], %s284_s11, %s284_s11, %s285_s12  }
 0x14e   :  { %281 = dma.done.wait [#allocation3], 256  }
 0x14f   :  { %282 = vsyncadd [#allocation3], 4294967040 }
 0x150   :  { %212 = vsyncpa [#allocation3], 1 }

</bundles_post_ra>
